<compile_context>
chip_gen: v7x
topology: tpu7x:2x2x1
jax: 0.10.0
libtpu: 0.0.40
codegen_flags: <defaults>
</compile_context>

<pallas_src>
from abc import ABCMeta, abstractmethod

import numpy as np
import jax
import jax.numpy as jnp
from jax.experimental import pallas as pl
from jax.experimental.pallas import tpu as pltpu

_LANE = 128      # vreg lane width: last block dim must be a multiple of this
_SUBLANE = 8     # vreg sublane count: second-minor block dim multiple
# Per-VMEM-buffer tile cap.  Input + output are each double-buffered, so peak
# VMEM use is ~4x this (24 MiB), which fits v7x (64 MiB physical), v6e
# (128 MiB) and v5e (128 MiB) once the scoped limit below is applied.
_MAX_TILE_BYTES = 6 * 1024 * 1024
_VMEM_LIMIT_BYTES = 32 * 1024 * 1024


def _identity_kernel(x_ref, o_ref):
    # Pass-through of the current (tile_rows, 128) lane-dense slab.
    # TODO(synk): concrete SeqEncStep subclasses replace this body with their
    # real encoding (e.g. an MXU Linear(F -> emsize) with an f32 accumulator,
    # N tile a multiple of 256 on v6e/v7x, 128 on v5e).
    o_ref[...] = x_ref[...]


def _passthrough_pallas(x: jax.Array) -> jax.Array:
    """Identity tensor path of the (abstract) encoder step.

    Layout strategy: collapse the tensor to a lane-dense (rows, 128) view,
    stream it in large row tiles (amortizes the ~0.35 us per-grid-step
    overhead), and alias input to output so the identity does not allocate or
    fill a second HBM buffer.
    """
    if x.size == 0:
        return x
    n = x.size
    if n % _LANE != 0:
        # Ragged total size: the identity contract allows returning the input
        # untouched.  TODO(synk): pad-and-slice path once a subclass adds
        # actual compute for non-lane-aligned feature counts.
        return x

    orig_shape = x.shape
    dtype = x.dtype
    rows = n // _LANE
    x2d = x.reshape(rows, _LANE)

    bytes_per_row = _LANE * x.dtype.itemsize
    max_rows = max(
        _SUBLANE, (_MAX_TILE_BYTES // bytes_per_row) // _SUBLANE * _SUBLANE
    )

    tile_rows = min(rows, max_rows)
    if tile_rows == rows and rows >= 2 * _SUBLANE:
        # Split into >= 2 grid steps so both v7x TensorCores get work.
        tile_rows = pl.cdiv(rows, 2)
    if tile_rows < rows:
        # Interior (non-full-extent) blocks must obey the (8, 128) rule.
        tile_rows = max(_SUBLANE, (tile_rows // _SUBLANE) * _SUBLANE)
    grid = (pl.cdiv(rows, tile_rows),)

    out2d = pl.pallas_call(
        _identity_kernel,
        out_shape=jax.ShapeDtypeStruct((rows, _LANE), dtype),
        grid_spec=pl.GridSpec(
            grid=grid,
            in_specs=[pl.BlockSpec((tile_rows, _LANE), lambda r: (r, 0))],
            out_specs=pl.BlockSpec((tile_rows, _LANE), lambda r: (r, 0)),
        ),
        input_output_aliases={0: 0},  # identity: reuse the input HBM buffer
        compiler_params=pltpu.CompilerParams(
            dimension_semantics=("parallel",),
            vmem_limit_bytes=_VMEM_LIMIT_BYTES,
        ),
    )(x2d)
    return out2d.reshape(orig_shape)


class SeqEncStep(metaclass=ABCMeta):
    """JAX/Pallas port of the SeqEncStep key-routing wrapper."""

    def __init__(self, in_keys=('main',), out_keys=('main',)):
        self.in_keys = in_keys
        self.out_keys = out_keys

    def forward(self, state, **kwargs):
        try:
            inputs = [state[in_key] for in_key in self.in_keys]
        except KeyError:
            raise KeyError(
                f'EncoderStep expected input keys {self.in_keys}, '
                f'but got {list(state.keys())}'
            )
        out = self._forward(*inputs, **kwargs)
        assert type(out) == tuple, \
            'EncoderStep must return a tuple of values (can be size 1)'
        assert len(out) == len(self.out_keys), (
            f"EncoderStep outputs don't match out_keys {len(out)} (out) != "
            f"{len(self.out_keys)} (out_keys = {self.out_keys})"
        )
        state.update({out_key: out[i] for i, out_key in enumerate(self.out_keys)})
        return state

    @abstractmethod
    def _forward(self, *args, **kwargs):
        # Abstract in the reference module: subclasses define the encoding.
        ...


class PassthroughSeqEncStep(SeqEncStep):
    """Minimal concrete step: streams each in_key tensor through the Pallas
    identity kernel.

    TODO(synk): real subclasses (e.g. a LinearInputEncoder) replace _forward
    with their projection kernel; the abstract base defines none.
    """

    def _forward(self, *args, **kwargs):
        return tuple(_passthrough_pallas(a) for a in args)


if __name__ == "__main__":
    key = jax.random.PRNGKey(0)

    # Small shapes consistent with the (seq, batch, features) convention.
    S, B, F = 8, 2, 32
    x = jax.random.normal(key, (S, B, F), dtype=jnp.float32)
    x_host = np.asarray(jax.device_get(x))

    step = PassthroughSeqEncStep(in_keys=('main',), out_keys=('main',))
    state = step.forward({'main': x})
    out = jax.block_until_ready(state['main'])

    assert out.shape == x_host.shape and out.dtype == jnp.float32
    np.testing.assert_array_equal(np.asarray(jax.device_get(out)), x_host)

    # Second (still small) shape exercising the multi-tile, grid >= 2 path.
    y = jax.random.normal(jax.random.PRNGKey(0), (32, 4, 128), dtype=jnp.float32)
    y_host = np.asarray(jax.device_get(y))
    state2 = step.forward({'main': y})
    out2 = jax.block_until_ready(state2['main'])
    assert out2.shape == y_host.shape and out2.dtype == jnp.float32
    np.testing.assert_array_equal(np.asarray(jax.device_get(out2)), y_host)

    print("KERNEL_OK")
</pallas_src>

<mosaic_0001>
module attributes {stable_mosaic.version = 11 : i64} {
  func.func @_identity_kernel(%arg0: i32, %arg1: memref<4x128xf32, #tpu.memory_space<vmem>>, %arg2: memref<4x128xf32, #tpu.memory_space<vmem>>) attributes {dimension_semantics = [#tpu.dimension_semantics<parallel>], iteration_bounds = array<i64: 1>, scalar_prefetch = 0 : i64, scratch_operands = 0 : i64, tpu.core_type = #tpu.core_type<tc>, window_params = [{transform_indices = @transform_0, window_bounds = array<i64: 4, 128>}, {transform_indices = @transform_1, window_bounds = array<i64: 4, 128>}]} {
    %c0 = arith.constant 0 : index
    %c0_0 = arith.constant 0 : index
    %0 = vector.load %arg1[%c0, %c0_0] : memref<4x128xf32, #tpu.memory_space<vmem>>, vector<4x128xf32>
    %c0_1 = arith.constant 0 : index
    %c0_2 = arith.constant 0 : index
    %1 = vector.load %arg2[%c0_1, %c0_2] : memref<4x128xf32, #tpu.memory_space<vmem>>, vector<4x128xf32>
    tpu.vector_store %arg2[%c0_1, %c0_2], %0 {strides = array<i32>} : memref<4x128xf32, #tpu.memory_space<vmem>>, vector<4x128xf32>,
    return
  }
  func.func @transform_0(%arg0: i32) -> (i32, i32) {
    %c0_i32 = arith.constant 0 : i32
    %c0_i32_0 = arith.constant 0 : i32
    return %arg0, %c0_i32 : i32, i32
  }
  func.func @transform_1(%arg0: i32) -> (i32, i32) {
    %c0_i32 = arith.constant 0 : i32
    %c0_i32_0 = arith.constant 0 : i32
    return %arg0, %c0_i32 : i32, i32
  }
}

</mosaic_0001>

<bundles_post_ra>
// kernel: tpu_custom_call.1
= control target key start
LH: loop header
LB: loop body
LE: loop exit
PB: predicated region body
PF: predicated region fallthrough
CT: control target
= control target key end

     0   :  { %6 = vsyncpa [#allocation3], 0  ;;  %s124_s0 = inlined_call_operand.hbm [shape: f32[4,128], index: 0, kind: input, shape index: {}, may-alias: {0,1}]   ;;  %s125_s1 = inlined_call_operand.hbm [shape: f32[4,128], index: 1, kind: output, shape index: {}, may-alias: {0,1}]  }
   0x1   :  { %7 = vsyncpa [#allocation4], 0  ;;  %s88_s6 = smov [#allocation2]   ;;  %s40_s10 = scalar_lea.hbm %s124_s0, 64 }
   0x2   :  { %s14_s7 = sshll.u32 %s88_s6, 4  ;;  %p41_p0 = scmp.ne.s32.totalorder %s124_s0, %s40_s10  ;;  %s15_s7 = int_to_ptr.vmem [resolvable:$true] %s14_s7 }
   0x3   :  { %p44_p1 = scmp.lt.u32.totalorder %s40_s10, %s124_s0 }
   0x5   :  { %p46_p2 = pnand %p44_p1, %p41_p0 }
   0x7   :  { %49 = shalt.err (!%p46_p2)
}
   0x8   :  { %s50_s15 = scalar_lea.vmem %s15_s7, 64  ;;  %p55_p4 = scmp.lt.s32.totalorder %s15_s7, %s15_s7 }
   0x9   :  { %p51_p3 = scmp.ne.s32.totalorder %s15_s7, %s50_s15  ;;  %p56_p5 = scmp.lt.s32.totalorder %s50_s15, %s50_s15 }
   0xb   :  { %p57_p6 = por %p56_p5, %p55_p4 }
   0xd   :  { %p58_p7 = pnand %p57_p6, %p51_p3 }
   0xf   :  { %61 = shalt.err (!%p58_p7)
}
  0x10   :  { %17 = dma.hbm_to_vmem [thread:$0]  %s124_s0, 64, %s15_s7, [#allocation3]  }
  0x11   :  { %84 = dma.done.wait [#allocation3], 64  }
  0x12   :  { %85 = vsyncadd [#allocation3], 4294967232  ;;  %s89_s18 = smov [#allocation5]   ;;  %v21_v0 = vld [vmem:[#allocation2] sm:$0xf] }
  0x13   :  { %s29_s19 = sshll.u32 %s89_s18, 4  ;;  %22 = vst [vmem:[#allocation5] sm:$0xf] %v21_v0  ;;  %s30_s19 = int_to_ptr.vmem [resolvable:$true] %s29_s19 }
  0x14   :  { %s62_s20 = scalar_lea.vmem %s30_s19, 64  ;;  %p67_p9 = scmp.lt.s32.totalorder %s30_s19, %s30_s19 }
  0x15   :  { %p63_p8 = scmp.ne.s32.totalorder %s30_s19, %s62_s20  ;;  %p68_p10 = scmp.lt.s32.totalorder %s62_s20, %s62_s20 }
  0x17   :  { %p69_p11 = por %p68_p10, %p67_p9 }
  0x19   :  { %p70_p12 = pnand %p69_p11, %p63_p8 }
  0x1b   :  { %73 = shalt.err (!%p70_p12)
}
  0x1c   :  { %s74_s23 = scalar_lea.hbm %s125_s1, 64 }
  0x1d   :  { %p75_p13 = scmp.ne.s32.totalorder %s125_s1, %s74_s23  ;;  %p78_p0 = scmp.lt.u32.totalorder %s74_s23, %s125_s1 }
  0x1f   :  { %p80_p1 = pnand %p78_p0, %p75_p13 }
  0x21   :  { %83 = shalt.err (!%p80_p1)
}
  0x22   :  { %32 = dma.vmem_to_hbm [thread:$0]  %s30_s19, 64, %s125_s1, [#allocation4]  }
  0x23   :  { %86 = dma.done.wait [#allocation4], 64  }
  0x24   :  { %87 = vsyncadd [#allocation4], 4294967232 }
  0x25   :  { %36 = vsyncpa [#allocation3], 1 }
  0x26   :  { %37 = vsyncpa [#allocation4], 1 }

</bundles_post_ra>
